<compile_context>
chip_gen: v6e
topology: v6e:2x2x1
jax: 0.10.0
libtpu: 0.0.40
codegen_flags: <defaults>
</compile_context>

<pallas_src>
import functools

import jax
import jax.numpy as jnp
from jax.experimental import pallas as pl
from jax.experimental.pallas import tpu as pltpu

BN_EPS = 1e-5


def _linear_trans_kernel(x_ref, w_ref, b_ref, g_ref, beta_ref, o_ref, acc_ref,
                         *, use_relu: bool, use_bn: bool, inv_n: float,
                         matmul_dtype):
    k = pl.program_id(1)

    @pl.when(k == 0)
    def _():
        acc_ref[...] = jnp.zeros_like(acc_ref)

    x = x_ref[...]                      # (N, tk)
    w = w_ref[...]                      # (tk, tn)
    if matmul_dtype is not None:
        # bf16 inputs halve HBM traffic and hit the fast MXU path on v6e/v7x;
        # accumulation stays in f32 so BN numerics are preserved.
        x = x.astype(matmul_dtype)
        w = w.astype(matmul_dtype)
    acc_ref[...] += jnp.dot(x, w, preferred_element_type=jnp.float32)

    # Epilogue only on the final K step: bias, activation, batch-norm, store.
    @pl.when(k == pl.num_programs(1) - 1)
    def _():
        y = acc_ref[...] + b_ref[...]                     # (N, tn) f32
        if use_relu:
            y = jnp.maximum(y, 0.0)
        if use_bn:
            # One-pass batch statistics over the (full, un-tiled) N axis.
            s = jnp.sum(y, axis=0, keepdims=True)          # (1, tn)
            ss = jnp.sum(y * y, axis=0, keepdims=True)     # (1, tn)
            mean = s * inv_n
            var = jnp.maximum(ss * inv_n - mean * mean, 0.0)
            y = (y - mean) * jax.lax.rsqrt(var + BN_EPS)   # rsqrt -> EUP
            y = y * g_ref[...] + beta_ref[...]
        o_ref[...] = y.astype(o_ref.dtype)


def _pad_axis(a, axis, mult, value=0.0):
    pad = (-a.shape[axis]) % mult
    if pad == 0:
        return a
    widths = [(0, 0)] * a.ndim
    widths[axis] = (0, pad)
    return jnp.pad(a, widths, constant_values=value)


def linear_trans(x, weight_t, bias, gamma, beta, *,
                 use_relu: bool = True, use_bn: bool = True,
                 tn: int = 128, tk: int = 128, matmul_dtype=None):
    """x: (N, in_dim); weight_t: (in_dim, out_dim); bias/gamma/beta: (1, out_dim).

    tn, tk must be multiples of 128 (lane-dense output tiles, MXU-friendly K).
    matmul_dtype=jnp.bfloat16 is recommended for large shapes on v6e/v7x.
    """
    N, in_dim = x.shape
    out_dim = weight_t.shape[1]

    # Zero-pad K and out_dim to tile multiples (matmul stays exact; padded
    # output columns have independent BN stats and are sliced off at the end).
    x_p = _pad_axis(x, 1, tk)
    w_p = _pad_axis(_pad_axis(weight_t, 0, tk), 1, tn)
    b_p = _pad_axis(bias, 1, tn)
    g_p = _pad_axis(gamma, 1, tn, value=1.0)
    be_p = _pad_axis(beta, 1, tn)
    in_p = x_p.shape[1]
    out_p = w_p.shape[1]

    grid = (out_p // tn, in_p // tk)          # (feature tiles, K tiles) — K last

    kernel = functools.partial(
        _linear_trans_kernel,
        use_relu=use_relu, use_bn=use_bn,
        inv_n=1.0 / float(N),                 # batch axis is never padded/tiled
        matmul_dtype=matmul_dtype,
    )

    itemsize = 4
    cost = pl.CostEstimate(
        flops=2 * N * in_p * out_p,
        transcendentals=out_p if use_bn else 0,
        bytes_accessed=(x_p.size * grid[0] + w_p.size + N * out_p
                        + 3 * out_p) * itemsize,
    )

    out_full = pl.pallas_call(
        kernel,
        out_shape=jax.ShapeDtypeStruct((N, out_p), x.dtype),
        grid_spec=pltpu.PrefetchScalarGridSpec(
            num_scalar_prefetch=0,
            grid=grid,
            in_specs=[
                pl.BlockSpec((N, tk), lambda j, k: (0, k)),    # x
                pl.BlockSpec((tk, tn), lambda j, k: (k, j)),   # W (transposed)
                pl.BlockSpec((1, tn), lambda j, k: (0, j)),    # bias
                pl.BlockSpec((1, tn), lambda j, k: (0, j)),    # gamma
                pl.BlockSpec((1, tn), lambda j, k: (0, j)),    # beta
            ],
            out_specs=pl.BlockSpec((N, tn), lambda j, k: (0, j)),
            scratch_shapes=[pltpu.VMEM((N, tn), jnp.float32)],  # f32 accumulator
        ),
        compiler_params=pltpu.CompilerParams(
            dimension_semantics=("parallel", "arbitrary")),
        cost_estimate=cost,
    )(x_p, w_p, b_p, g_p, be_p)

    return out_full[:, :out_dim] if out_p != out_dim else out_full


def _reference(x, weight_t, bias, gamma, beta, use_relu=True, use_bn=True):
    y = jnp.dot(x, weight_t) + bias
    if use_relu:
        y = jnp.maximum(y, 0.0)
    if use_bn:
        mean = jnp.mean(y, axis=0, keepdims=True)
        var = jnp.mean((y - mean) ** 2, axis=0, keepdims=True)
        y = (y - mean) / jnp.sqrt(var + BN_EPS)
        y = y * gamma + beta
    return y


if __name__ == "__main__":
    key = jax.random.PRNGKey(0)
    k_x, k_w, k_b = jax.random.split(key, 3)

    # Small shapes, chosen to exercise the tiled grid AND the padding path:
    # in_dim=320 -> padded to 384 (3 K-tiles); out_dim=320 -> padded to 384
    # (3 feature tiles); batch N=128 stays fully resident per block (exact BN).
    N, in_dim, out_dim = 128, 320, 320

    x = jax.random.normal(k_x, (N, in_dim), dtype=jnp.float32)

    # nn.Linear-like init; BN affine = ones/zeros (fresh module in .train()).
    bound = 1.0 / (in_dim ** 0.5)
    weight_t = jax.random.uniform(k_w, (in_dim, out_dim),
                                  minval=-bound, maxval=bound,
                                  dtype=jnp.float32)
    bias = jax.random.uniform(k_b, (1, out_dim),
                              minval=-bound, maxval=bound, dtype=jnp.float32)
    gamma = jnp.ones((1, out_dim), dtype=jnp.float32)
    beta = jnp.zeros((1, out_dim), dtype=jnp.float32)

    out = linear_trans(x, weight_t, bias, gamma, beta,
                       use_relu=True, use_bn=True,
                       tn=128, tk=128, matmul_dtype=None)
    out = jax.block_until_ready(out)

    ref = _reference(x, weight_t, bias, gamma, beta)
    assert out.shape == (N, out_dim)
    assert jnp.allclose(out, ref, atol=1e-4, rtol=1e-4), "mismatch vs reference"

    print("KERNEL_OK")
</pallas_src>

<mosaic_0001>
module attributes {stable_mosaic.version = 11 : i64} {
  func.func @_linear_trans_kernel(%arg0: i32, %arg1: i32, %arg2: memref<128x128xf32, #tpu.memory_space<vmem>>, %arg3: memref<128x128xf32, #tpu.memory_space<vmem>>, %arg4: memref<1x128xf32, #tpu.memory_space<vmem>>, %arg5: memref<1x128xf32, #tpu.memory_space<vmem>>, %arg6: memref<1x128xf32, #tpu.memory_space<vmem>>, %arg7: memref<128x128xf32, #tpu.memory_space<vmem>>, %arg8: memref<128x128xf32, #tpu.memory_space<vmem>>) attributes {dimension_semantics = [#tpu.dimension_semantics<parallel>, #tpu.dimension_semantics<arbitrary>], iteration_bounds = array<i64: 3, 3>, scalar_prefetch = 0 : i64, scratch_operands = 1 : i64, tpu.core_type = #tpu.core_type<tc>, window_params = [{transform_indices = @transform_0, window_bounds = array<i64: 128, 128>}, {transform_indices = @transform_1, window_bounds = array<i64: 128, 128>}, {transform_indices = @transform_2, window_bounds = array<i64: 1, 128>}, {transform_indices = @transform_3, window_bounds = array<i64: 1, 128>}, {transform_indices = @transform_4, window_bounds = array<i64: 1, 128>}, {transform_indices = @transform_5, window_bounds = array<i64: 128, 128>}]} {
    %c0_i32 = arith.constant 0 : i32
    %0 = arith.cmpi eq, %arg1, %c0_i32 : i32
    %1 = arith.extui %0 : i1 to i32
    %c0_i32_0 = arith.constant 0 : i32
    %2 = arith.cmpi ne, %1, %c0_i32_0 : i32
    scf.if %2 {
      %cst_9 = arith.constant 0.000000e+00 : f32
      %12 = vector.broadcast %cst_9 : f32 to vector<128x128xf32>
      %c0_10 = arith.constant 0 : index
      %c0_11 = arith.constant 0 : index
      %13 = vector.load %arg8[%c0_10, %c0_11] : memref<128x128xf32, #tpu.memory_space<vmem>>, vector<128x128xf32>
      tpu.vector_store %arg8[%c0_10, %c0_11], %12 {strides = array<i32>} : memref<128x128xf32, #tpu.memory_space<vmem>>, vector<128x128xf32>,
    } else {
    }
    %c0 = arith.constant 0 : index
    %c0_1 = arith.constant 0 : index
    %3 = vector.load %arg2[%c0, %c0_1] : memref<128x128xf32, #tpu.memory_space<vmem>>, vector<128x128xf32>
    %c0_2 = arith.constant 0 : index
    %c0_3 = arith.constant 0 : index
    %4 = vector.load %arg3[%c0_2, %c0_3] : memref<128x128xf32, #tpu.memory_space<vmem>>, vector<128x128xf32>
    %c0_4 = arith.constant 0 : index
    %c0_5 = arith.constant 0 : index
    %5 = vector.load %arg8[%c0_4, %c0_5] : memref<128x128xf32, #tpu.memory_space<vmem>>, vector<128x128xf32>
    %cst = arith.constant dense<0.000000e+00> : vector<128x128xf32>
    %6 = tpu.matmul %3, %4, %cst {dimension_numbers = #tpu.dot_dimension_numbers<[1], [0], [0], [1], [0, 0, 1, 1], [], []>} : vector<128x128xf32>, vector<128x128xf32>, vector<128x128xf32> -> vector<128x128xf32>
    %7 = arith.addf %5, %6 : vector<128x128xf32>
    %c0_6 = arith.constant 0 : index
    %c0_7 = arith.constant 0 : index
    %8 = vector.load %arg8[%c0_6, %c0_7] : memref<128x128xf32, #tpu.memory_space<vmem>>, vector<128x128xf32>
    tpu.vector_store %arg8[%c0_6, %c0_7], %7 {strides = array<i32>} : memref<128x128xf32, #tpu.memory_space<vmem>>, vector<128x128xf32>,
    %c2_i32 = arith.constant 2 : i32
    %9 = arith.cmpi eq, %arg1, %c2_i32 : i32
    %10 = arith.extui %9 : i1 to i32
    %c0_i32_8 = arith.constant 0 : i32
    %11 = arith.cmpi ne, %10, %c0_i32_8 : i32
    scf.if %11 {
      %c0_9 = arith.constant 0 : index
      %c0_10 = arith.constant 0 : index
      %12 = vector.load %arg8[%c0_9, %c0_10] : memref<128x128xf32, #tpu.memory_space<vmem>>, vector<128x128xf32>
      %c0_11 = arith.constant 0 : index
      %c0_12 = arith.constant 0 : index
      %13 = vector.load %arg4[%c0_11, %c0_12] : memref<1x128xf32, #tpu.memory_space<vmem>>, vector<1x128xf32>
      %14 = vector.broadcast %13 : vector<1x128xf32> to vector<128x128xf32>
      %15 = arith.addf %12, %14 : vector<128x128xf32>
      %cst_13 = arith.constant 0.000000e+00 : f32
      %16 = vector.broadcast %cst_13 : f32 to vector<128x128xf32>
      %17 = arith.maximumf %15, %16 : vector<128x128xf32>
      %cst_14 = arith.constant dense<0.000000e+00> : vector<128xf32>
      %18 = vector.multi_reduction <add>, %17, %cst_14 [0] : vector<128x128xf32> to vector<128xf32>
      %19 = vector.shape_cast %18 : vector<128xf32> to vector<1x128xf32>
      %20 = arith.mulf %17, %17 : vector<128x128xf32>
      %cst_15 = arith.constant dense<0.000000e+00> : vector<128xf32>
      %21 = vector.multi_reduction <add>, %20, %cst_15 [0] : vector<128x128xf32> to vector<128xf32>
      %22 = vector.shape_cast %21 : vector<128xf32> to vector<1x128xf32>
      %cst_16 = arith.constant 7.812500e-03 : f32
      %23 = vector.broadcast %cst_16 : f32 to vector<1x128xf32>
      %24 = arith.mulf %19, %23 : vector<1x128xf32>
      %cst_17 = arith.constant 7.812500e-03 : f32
      %25 = vector.broadcast %cst_17 : f32 to vector<1x128xf32>
      %26 = arith.mulf %22, %25 : vector<1x128xf32>
      %27 = arith.mulf %24, %24 : vector<1x128xf32>
      %28 = arith.subf %26, %27 : vector<1x128xf32>
      %cst_18 = arith.constant 0.000000e+00 : f32
      %29 = vector.broadcast %cst_18 : f32 to vector<1x128xf32>
      %30 = arith.maximumf %28, %29 : vector<1x128xf32>
      %31 = vector.broadcast %24 : vector<1x128xf32> to vector<128x128xf32>
      %32 = arith.subf %17, %31 : vector<128x128xf32>
      %cst_19 = arith.constant 9.99999974E-6 : f32
      %33 = vector.broadcast %cst_19 : f32 to vector<1x128xf32>
      %34 = arith.addf %30, %33 : vector<1x128xf32>
      %35 = math.rsqrt %34 : vector<1x128xf32>
      %36 = vector.broadcast %35 : vector<1x128xf32> to vector<128x128xf32>
      %37 = arith.mulf %32, %36 : vector<128x128xf32>
      %c0_20 = arith.constant 0 : index
      %c0_21 = arith.constant 0 : index
      %38 = vector.load %arg5[%c0_20, %c0_21] : memref<1x128xf32, #tpu.memory_space<vmem>>, vector<1x128xf32>
      %39 = vector.broadcast %38 : vector<1x128xf32> to vector<128x128xf32>
      %40 = arith.mulf %37, %39 : vector<128x128xf32>
      %c0_22 = arith.constant 0 : index
      %c0_23 = arith.constant 0 : index
      %41 = vector.load %arg6[%c0_22, %c0_23] : memref<1x128xf32, #tpu.memory_space<vmem>>, vector<1x128xf32>
      %42 = vector.broadcast %41 : vector<1x128xf32> to vector<128x128xf32>
      %43 = arith.addf %40, %42 : vector<128x128xf32>
      %c0_24 = arith.constant 0 : index
      %c0_25 = arith.constant 0 : index
      %44 = vector.load %arg7[%c0_24, %c0_25] : memref<128x128xf32, #tpu.memory_space<vmem>>, vector<128x128xf32>
      tpu.vector_store %arg7[%c0_24, %c0_25], %43 {strides = array<i32>} : memref<128x128xf32, #tpu.memory_space<vmem>>, vector<128x128xf32>,
    } else {
    }
    return
  }
  func.func @transform_0(%arg0: i32, %arg1: i32) -> (i32, i32) {
    %c0_i32 = arith.constant 0 : i32
    %c0_i32_0 = arith.constant 0 : i32
    return %c0_i32, %arg1 : i32, i32
  }
  func.func @transform_1(%arg0: i32, %arg1: i32) -> (i32, i32) {
    %c0_i32 = arith.constant 0 : i32
    return %arg1, %arg0 : i32, i32
  }
  func.func @transform_2(%arg0: i32, %arg1: i32) -> (i32, i32) {
    %c0_i32 = arith.constant 0 : i32
    %c0_i32_0 = arith.constant 0 : i32
    return %c0_i32, %arg0 : i32, i32
  }
  func.func @transform_3(%arg0: i32, %arg1: i32) -> (i32, i32) {
    %c0_i32 = arith.constant 0 : i32
    %c0_i32_0 = arith.constant 0 : i32
    return %c0_i32, %arg0 : i32, i32
  }
  func.func @transform_4(%arg0: i32, %arg1: i32) -> (i32, i32) {
    %c0_i32 = arith.constant 0 : i32
    %c0_i32_0 = arith.constant 0 : i32
    return %c0_i32, %arg0 : i32, i32
  }
  func.func @transform_5(%arg0: i32, %arg1: i32) -> (i32, i32) {
    %c0_i32 = arith.constant 0 : i32
    %c0_i32_0 = arith.constant 0 : i32
    return %c0_i32, %arg0 : i32, i32
  }
}

</mosaic_0001>

<bundles_post_ra>
// kernel: tpu_custom_call.1
= control target key start
LH: loop header
LB: loop body
LE: loop exit
PB: predicated region body
PF: predicated region fallthrough
CT: control target
= control target key end

     0   :  { %s2105_s0 = inlined_call_operand.hbm [shape: f32[128,384], index: 0, kind: input, shape index: {}]   ;;  %s2106_s1 = inlined_call_operand.hbm [shape: f32[384,384], index: 1, kind: input, shape index: {}]   ;;  %s2107_s2 = inlined_call_operand.vmem [shape: f32[1,384], index: 2, kind: input, shape index: {}]   ;;  %s2108_s3 = inlined_call_operand.hbm [shape: f32[1,384], index: 3, kind: input, shape index: {}]   ;;  %s2109_s4 = inlined_call_operand.vmem [shape: f32[1,384], index: 4, kind: input, shape index: {}]   ;;  %s2110_s5 = inlined_call_operand.hbm [shape: f32[128,384], index: 5, kind: output, shape index: {}]  }
   0x1   :  { %2123 = sst [smem:[#allocation21_spill]] %s2105_s0 }
   0x2   :  { %2124 = sst [smem:[#allocation22_spill]] %s2106_s1 }
   0x3   :  { %2125 = sst [smem:[#allocation23_spill]] %s2107_s2 }
   0x4   :  { %2126 = sst [smem:[#allocation24_spill]] %s2108_s3 }
   0x5   :  { %2127 = sst [smem:[#allocation25_spill]] %s2109_s4 }
   0x6   :  { %2128 = sst [smem:[#allocation26_spill]] %s2110_s5 }
   0x7   :  { %10 = vsyncpa [#allocation4], 0 }
   0x8   :  { %12 = vsyncpa [#allocation4 + $0x1], 0 }
   0x9   :  { %13 = vsyncpa [#allocation7], 0 }
   0xa   :  { %15 = vsyncpa [#allocation7 + $0x1], 0 }
   0xb   :  { %16 = vsyncpa [#allocation5], 0 }
   0xc   :  { %18 = vsyncpa [#allocation5 + $0x1], 0  ;;  %s1547_s18 = smov 0   ;;  %s1549_s19 = smov 0  }
   0xd   :  { %s1551_s20 = smov 0   ;;  %s1553_s21 = smov 0  }
   0xe   :  { %s1555_s22 = smov 0   ;;  %s1557_s23 = smov 0  }
   0xf   :  { %s1559_s24 = smov 0   ;;  %s1561_s25 = smov 0  }
  0x10   :  { %s1563_s26 = smov 0   ;;  %s1565_s27 = smov 0  }
  0x11   :  { %s1567_s28 = smov 0   ;;  %s1569_s29 = smov 0  }
  0x12   :  { %s1571_s30 = smov 0   ;;  %s1573_s6 = smov 0  }
  0x13 LB: > { %2129 = sst [smem:[#allocation14_spill]] %s1488_s27  ;;  %s33_s7 = sadd.s32 1, %s1496_s29  ;;  %s1504_s6 = sphi %s1573_s6, %s24_s6   ;;  %s1500_s30 = sphi %s1571_s30, %s2173_s30   ;;  %s1496_s29 = sphi %s1569_s29, %s2172_s29   ;;  %s1492_s28 = sphi %s1567_s28, %s2184_s28   ;;  %s1488_s27 = sphi %s1565_s27, %s2170_s27   ;;  %s1484_s26 = sphi %s1563_s26, %s2183_s26   ;;  %s1480_s25 = sphi %s1561_s25, %s2182_s25   ;;  %s1476_s24 = sphi %s1559_s24, %s2181_s24   ;;  %s1472_s23 = sphi %s1557_s23, %s2180_s23   ;;  %s1468_s22 = sphi %s1555_s22, %s2179_s22   ;;  %s1464_s21 = sphi %s1553_s21, %s2178_s21   ;;  %s1460_s20 = sphi %s1551_s20, %s2177_s20   ;;  %s1456_s19 = sphi %s1549_s19, %s2176_s19   ;;  %s1452_s18 = sphi %s1547_s18, %s2175_s18  }
  0x14   : > { %2130 = sst [smem:[#allocation15_spill]] %s1492_s28  ;;  %p1619_p0 = scmp.ge.s32.totalorder %s33_s7, 3 }
  0x15   : > { %2131 = sst [smem:[#allocation16_spill]] %s1496_s29  ;;  %p51_p1 = scmp.eq.s32.totalorder %s1504_s6, 0 }
  0x16   : > { %2132 = sst [smem:[#allocation17_spill]] %s1500_s30  ;;  %p78_p2 = scmp.ne.s32.totalorder %s1472_s23, %s1468_s22 }
  0x17   : > { %s2186_s7 = smov (%p1619_p0, %s33_s7), 0  ;;  %p84_p4 = scmp.ne.s32.totalorder %s1468_s22, %s1464_s21 }
  0x18   : > { %2134 = sst [smem:[#allocation18_spill]] %s2186_s7  ;;  %p80_p3 = por %p78_p2, %p51_p1 }
  0x19   : > { %s1637_s11 = ssub.s32 %s1496_s29, %s2186_s7  ;;  %p2117_p6 = scmp.lt.s32.totalorder %s1504_s6, 9 }
  0x1a   : > { %p41_p5 = scmp.eq.s32.totalorder %s1637_s11, 0  ;;  %s232_s12 = sand.u32 1, %s1504_s6  }
  0x1b   : > { %s234_s13 = sand.u32 1, %s1472_s23   ;;  %s1122_s15 = smul.u32 48, %s1496_s29 }
  0x1c   : > { %s984_s14 = sshll.u32 %s234_s13, 7  ;;  %p1646_p7 = pnand %p2117_p6, %p80_p3 }
  0x1d   : > { %s242_s17 = sadd.s32 %s1500_s30, %s1122_s15  ;;  %s236_s10 = scalar_lea.vmem [#allocation6], %s984_s14 }
  0x1e   : > { %s245_s8 = sshll.u32 %s236_s10, 4  ;;  %s987_s5 = sshll.u32 %s242_s17, 7  ;;  %s246_s8 = int_to_ptr.vmem [resolvable:$true] %s245_s8 }
  0x1f   : > { %s2136_s1 = sld [smem:[#allocation22_spill]]  ;;  %s1654_s2 = scalar_lea.sflag [#allocation7], %s232_s12 }
  0x20   : > { %p1270_p8 = pneg %p1646_p7  ;;  %s1281_s13 = scalar_lea.vmem %s246_s8, 2048 }
  0x21   : > { %p1282_p9 = scmp.ne.s32.totalorder %s246_s8, %s1281_s13  ;;  %s1506_s28 = smov [#allocation6]  }
  0x22   : > { %s1286_s3 = sshll.u32 %s1506_s28, 4  ;;  %s1287_s3 = int_to_ptr.vmem [resolvable:$false] %s1286_s3 }
  0x23   : > { %p1284_p10 = pnand %p1282_p9, %p1270_p8  ;;  %s1288_s15 = scalar_lea.vmem %s1287_s3, 4096 }
  0x24   : > { %p1289_p12 = scmp.lt.s32.totalorder %s246_s8, %s1287_s3  ;;  %p1290_p13 = scmp.lt.s32.totalorder %s1288_s15, %s1281_s13 }
  0x25   : > { %s244_s4 = scalar_lea.hbm %s2136_s1, %s987_s5  ;;  %p1285_p11 = pneg %p1284_p10 }
  0x26   : > { %p1291_p2 = por %p1290_p13, %p1289_p12 }
  0x28   : > { %p1292_p3 = pnand %p1291_p2, %p1285_p11 }
  0x2a   : > { %1295 = shalt.err (!%p1292_p3)
}
  0x2b   : > { %s2114_s10 = smov 384   ;;  %s2115_s3 = smov 128  }
  0x2c   : > { %s2116_s5 = smov 8   ;;  %p989_p8 = scmp.ge.s32.totalorder %s1504_s6, 1 }
  0x2d   : > { %1137 = dma.hbm_to_vmem [thread:$0]  (!%p1646_p7), %s244_s4, 2048, %s246_s8, %s1654_s2, %s2114_s10, %s2115_s3, %s2116_s5  }
  0x2e   : > { %p282_p9 = scmp.lt.s32.totalorder %s1504_s6, 10  ;;  %s43_s28 = sadd.s32 1, %s1484_s26 }
  0x2f   : > { %s1674_s7 = scalar_select %p41_p5, %s1484_s26, %s43_s28  }
  0x30   : > { %p1666_p10 = pnand %p989_p8, %p282_p9  ;;  %p50_p11 = scmp.ne.s32.totalorder %s1484_s26, %s1480_s25 }
  0x31   : > { %2138 = sst [smem:[#allocation19_spill]] %s1674_s7  ;;  %p56_p12 = scmp.ne.s32.totalorder %s1480_s25, %s1476_s24 }
  0x32   : > { %s212_s12 = sand.u32 1, %s1484_s26   ;;  %s983_s14 = sshll.u32 %s1496_s29, 7 }
  0x33   : > { %p52_p13 = por %p51_p1, %p50_p11  ;;  %s982_s16 = sshll.u32 %s212_s12, 7 }
  0x34   : > { %s2139_s0 = sld [smem:[#allocation21_spill]]  ;;  %s216_s15 = scalar_lea.vmem [#allocation3], %s982_s16 }
  0x35   : > { %p1689_p7 = pnand %p2117_p6, %p52_p13  ;;  %s222_s28 = sshll.u32 %s216_s15, 4  ;;  %s223_s28 = int_to_ptr.vmem [resolvable:$true] %s222_s28 }
  0x36   : > { %s213_s10 = scalar_lea.sflag [#allocation4], %s212_s12  ;;  %s1309_s3 = scalar_lea.vmem %s223_s28, 2048 }
  0x37   : > { %p1298_p5 = pneg %p1689_p7  ;;  %p1310_p2 = scmp.ne.s32.totalorder %s223_s28, %s1309_s3 }
  0x38   : > { %s1510_s5 = smov [#allocation3]  }
  0x39   : > { %p1312_p3 = pnand %p1310_p2, %p1298_p5  ;;  %s1314_s1 = sshll.u32 %s1510_s5, 4  ;;  %s1315_s1 = int_to_ptr.vmem [resolvable:$false] %s1314_s1 }
  0x3a   : > { %s221_s4 = scalar_lea.hbm %s2139_s0, %s983_s14  ;;  %s1316_s14 = scalar_lea.vmem %s1315_s1, 4096 }
  0x3b   : > { %p1313_p8 = pneg %p1312_p3  ;;  %p1317_p9 = scmp.lt.s32.totalorder %s223_s28, %s1315_s1 }
  0x3c   : > { %p1318_p11 = scmp.lt.s32.totalorder %s1316_s14, %s1309_s3 }
  0x3e   : > { %p1319_p13 = por %p1318_p11, %p1317_p9 }
  0x40   : > { %p1320_p6 = pnand %p1319_p13, %p1313_p8 }
  0x42   : > { %1323 = shalt.err (!%p1320_p6)
}
  0x43   : > { %s2141_s16 = smov 8   ;;  %s2142_s17 = smov 128  }
  0x44   : > { %s2143_s12 = smov 384   ;;  %s1701_s1 = sadd.s32 4294967295, %s1504_s6  }
  0x45   : > { %1134 = dma.hbm_to_vmem [thread:$0]  (!%p1689_p7), %s221_s4, 2048, %s223_s28, %s213_s10, %s2143_s12, %s2142_s17, %s2141_s16  }
  0x46   : > { %s979_s3 = sadd.s32 4294967294, %s1504_s6   ;;  %p57_p6 = scmp.eq.s32.totalorder %s1701_s1, 0 }
  0x47   : > { %s2144_s5 = sadd.s32 1, %s1500_s30  ;;  %s123_s4 = sadd.s32 1, %s1460_s20 }
  0x48   : > { %s2188_s5 = smov (!%p1619_p0, %s2144_s5), %s1500_s30  ;;  %p1713_p5 = por %p57_p6, %p56_p12 }
  0x49   : > { %p1720_p7 = por %p84_p4, %p57_p6  ;;  %p38_p2 = scmp.ge.s32.totalorder %s2188_s5, 3 }
  0x4a   : > { %p130_p3 = scmp.ne.s32.totalorder %s1460_s20, %s1456_s19  ;;  %p136_p0 = scmp.ne.s32.totalorder %s1456_s19, %s1452_s18 }
  0x4b   : > { %s2190_s5 = smov (%p38_p2, %s2188_s5), 0  ;;  %p186_p8 = scmp.eq.s32.totalorder %s1701_s1, 8 }
  0x4c   : > { %2147 = sst [smem:[#allocation20_spill]] %s2190_s5  ;;  %p1733_p12 = por %p130_p3, %p51_p1 }
  0x4d   : > { %p1740_p4 = por %p136_p0, %p57_p6  ;;  %s67_s9 = ssub.s32 %s1500_s30, %s2190_s5 }
  0x4e   : > { %s68_s8 = sor.u32 %s67_s9, %s1637_s11  ;;  %p121_p9 = scmp.eq.s32.totalorder %s67_s9, 0 }
  0x4f   : > { %s2149_s24 = scalar_select %p1740_p4, 1, 0 }
  0x50   : > { %p69_p11 = scmp.eq.s32.totalorder %s68_s8, 0  ;;  %p1748_p13 = por %p186_p8, %p130_p3 }
  0x51   : > { %s1753_s28 = scalar_select %p121_p9, %s1460_s20, %s123_s4  }
  0x52   : > { %s2150_s15 = scalar_select %p1748_p13, 1, 0 }
  0x53   : > { %s2151_s14 = sadd.s32 1, %s1472_s23  ;;  %p192_p1 = scmp.eq.s32.totalorder %s979_s3, 8 }
  0x54   : > { %s1758_s16 = scalar_select %p69_p11, %s1472_s23, %s2151_s14  }
  0x55   : > { %s263_s17 = sand.u32 1, %s1460_s20   ;;  %s988_s12 = sshll.u32 %s1500_s30, 4 }
  0x56   : > { %p1765_p6 = por %p192_p1, %p136_p0  ;;  %s2153_s8 = sld [smem:[#allocation24_spill]] }
  0x57   : > { %s264_s29 = scalar_lea.vmem [#allocation8], %s263_s17  ;;  %p2154_p2 = scmp.lt.s32.totalorder %s1504_s6, 9 }
  0x58   : > { %s2152_s0 = scalar_select %p1765_p6, 1, 0 }
  0x59   : > { %s271_s7 = sshll.u32 %s264_s29, 4  ;;  %p1776_p3 = pnand %p2154_p2, %p1733_p12  ;;  %s272_s7 = int_to_ptr.vmem [resolvable:$true] %s271_s7 }
  0x5a   : > { %s1337_s3 = scalar_lea.vmem %s272_s7, 16  ;;  %s1511_s14 = smov [#allocation8]  }
  0x5b   : > { %p1326_p8 = pneg %p1776_p3  ;;  %p1338_p0 = scmp.ne.s32.totalorder %s272_s7, %s1337_s3 }
  0x5c   : > { %s269_s5 = scalar_lea.hbm %s2153_s8, %s988_s12  ;;  %s1342_s30 = sshll.u32 %s1511_s14, 4  ;;  %s1343_s30 = int_to_ptr.vmem [resolvable:$false] %s1342_s30 }
  0x5d   : > { %p1340_p9 = pnand %p1338_p0, %p1326_p8  ;;  %s1344_s12 = scalar_lea.vmem %s1343_s30, 32 }
  0x5e   : > { %p1345_p1 = scmp.lt.s32.totalorder %s272_s7, %s1343_s30  ;;  %p1346_p6 = scmp.lt.s32.totalorder %s1344_s12, %s1337_s3 }
  0x5f   : > { %p1341_p11 = pneg %p1340_p9 }
  0x60   : > { %p1347_p13 = por %p1346_p6, %p1345_p1 }
  0x62   : > { %p1348_p4 = pnand %p1347_p13, %p1341_p11 }
  0x64   : > { %1351 = shalt.err (!%p1348_p4)
}
  0x65   : > { %1140 = dma.hbm_to_vmem [thread:$0]  (!%p1776_p3), %s269_s5, 16, %s272_s7, %s1654_s2  }
  0x66   : > { %286 = sbr.rel (%p1666_p10) target bundleno = 502 (0x1f6), region = 40  ;;  %s288_s29 = sand.u32 (!%p1666_p10), 1, %s1480_s25  }
  0x67   : > { %s990_s21 = sshll.u32 (!%p1666_p10), %s288_s29, 7  ;;  %s289_s17 = scalar_lea.sflag (!%p1666_p10), [#allocation4], %s288_s29 }
  0x68   : > { %s1788_s11 = scalar_lea.vmem (!%p1666_p10), [#allocation3], %s990_s21 }
  0x6b   : > { %1435 = dma.done.wait (%p1713_p5), %s289_s17, 2048  }
  0x6c   : > { %1437 = vsyncadd (%p1713_p5), %s289_s17, 4294965248  ;;  %s297_s30 = sand.u32 1, %s1701_s1   ;;  %s299_s2 = sand.u32 1, %s1468_s22  }
  0x6d   : > { %s991_s7 = sshll.u32 %s299_s2, 7  ;;  %s298_s27 = scalar_lea.sflag [#allocation7], %s297_s30 }
  0x6e   : > { %s1796_s5 = scalar_lea.vmem [#allocation6], %s991_s7 }
  0x6f   : > { %1439 = dma.done.wait (%p1720_p7), %s298_s27, 2048  }
  0x70   : > { %1441 = vsyncadd (%p1720_p7), %s298_s27, 4294965248  ;;  %s1803_s9 = sand.u32 1, %s1456_s19   ;;  %p2156_p10 = scmp.ne.s32.totalorder %s2149_s24, 0 }
  0x71   : > { %s309_s13 = scalar_lea.vmem [#allocation8], %s1803_s9 }
  0x72   : > { %1443 = dma.done.wait (%p2156_p10), %s298_s27, 16  }
  0x73   : > { %1445 = vsyncadd (%p2156_p10), %s298_s27, 4294967280  ;;  %s2157_s1 = sld [smem:[#allocation15_spill]]  ;;  %s992_s8 = sshll.u32 %s1803_s9, 7 }
  0x74   : > { %s2158_s3 = sld [smem:[#allocation23_spill]]  ;;  %s1823_s30 = scalar_lea.vmem [#allocation9], %s992_s8 }
  0x75   : > { %s2159_s21 = sld [smem:[#allocation25_spill]] }
  0x76   : > { %s2160_s24 = sld [smem:[#allocation14_spill]] }
  0x79   : > { %p352_p5 = scmp.lt.s32.totalorder %s2157_s1, 2 }
  0x7b   : > { %s2192_s1 = smov (!%p352_p5, %s2157_s1), 2 }
  0x7c   : > { %s354_s14 = scalar_lea.vmem %s2158_s3, %s2192_s1  ;;  %s357_s17 = scalar_lea.vmem %s2159_s21, %s2192_s1 }
  0x7d   : > { %p993_p7 = scmp.ne.s32.totalorder %s2160_s24, 0 }
  0x7f   : > { %361 = sbr.rel (%p993_p7) target bundleno = 141 (0x8d), region = 56 }
  0x84   : > { %v1512_v0 = vmov 0.0  }
  0x85   : > { %362 = vst [vmem:[#allocation2 + $0x30] sm:$0xff] %v1512_v0  ;;  %363 = vst [vmem:[#allocation2] sm:$0xff] %v1512_v0 }
  0x86   : > { %364 = vst [vmem:[#allocation2 + $0x58] sm:$0xff] %v1512_v0  ;;  %365 = vst [vmem:[#allocation2 + $0x18] sm:$0xff] %v1512_v0 }
  0x87   : > { %366 = vst [vmem:[#allocation2 + $0x50] sm:$0xff] %v1512_v0  ;;  %367 = vst [vmem:[#allocation2 + $0x68] sm:$0xff] %v1512_v0 }
  0x88   : > { %368 = vst [vmem:[#allocation2 + $0x8] sm:$0xff] %v1512_v0  ;;  %369 = vst [vmem:[#allocation2 + $0x48] sm:$0xff] %v1512_v0 }
  0x89   : > { %370 = vst [vmem:[#allocation2 + $0x40] sm:$0xff] %v1512_v0  ;;  %371 = vst [vmem:[#allocation2 + $0x20] sm:$0xff] %v1512_v0 }
  0x8a   : > { %372 = vst [vmem:[#allocation2 + $0x10] sm:$0xff] %v1512_v0  ;;  %373 = vst [vmem:[#allocation2 + $0x38] sm:$0xff] %v1512_v0 }
  0x8b   : > { %374 = vst [vmem:[#allocation2 + $0x60] sm:$0xff] %v1512_v0  ;;  %375 = vst [vmem:[#allocation2 + $0x70] sm:$0xff] %v1512_v0 }
  0x8c   : > { %376 = vst [vmem:[#allocation2 + $0x78] sm:$0xff] %v1512_v0  ;;  %377 = vst [vmem:[#allocation2 + $0x28] sm:$0xff] %v1512_v0 }
  0x8d PF: > { %v409_v1 = vld [vmem:[%s1796_s5 + $0x78] sm:$0xff]  ;;  %v408_v2 = vld [vmem:[%s1796_s5 + $0x70] sm:$0xff]  ;;  %v407_v3 = vld [vmem:[%s1796_s5 + $0x68] sm:$0xff] }
  0x8e   : > { %1034 = vmatprep.subr.mxu0 %v409_v1  ;;  %1090 = vmatprep.subr.mxu1 %v409_v1  ;;  %v406_v4 = vld [vmem:[%s1796_s5 + $0x60] sm:$0xff]  ;;  %v405_v5 = vld [vmem:[%s1796_s5 + $0x58] sm:$0xff]  ;;  %v404_v6 = vld [vmem:[%s1796_s5 + $0x50] sm:$0xff] }
  0x8f   : > { %1035 = vmatpush3.msra.mxu0 %v409_v1  ;;  %1106 = vmatpush3.msra.mxu1 %v409_v1  ;;  %v403_v7 = vld [vmem:[%s1796_s5 + $0x48] sm:$0xff]  ;;  %v402_v8 = vld [vmem:[%s1796_s5 + $0x40] sm:$0xff]  ;;  %v401_v9 = vld [vmem:[%s1796_s5 + $0x38] sm:$0xff] }
  0x90   : > { %1036 = vmatprep.subr.mxu0 %v408_v2  ;;  %1091 = vmatprep.subr.mxu1 %v408_v2  ;;  %v400_v10 = vld [vmem:[%s1796_s5 + $0x30] sm:$0xff]  ;;  %v399_v11 = vld [vmem:[%s1796_s5 + $0x28] sm:$0xff]  ;;  %v398_v12 = vld [vmem:[%s1796_s5 + $0x20] sm:$0xff] }
  0x91   : > { %1037 = vmatpush3.msra.mxu0 %v408_v2  ;;  %1107 = vmatpush3.msra.mxu1 %v408_v2  ;;  %v397_v13 = vld [vmem:[%s1796_s5 + $0x18] sm:$0xff]  ;;  %v396_v14 = vld [vmem:[%s1796_s5 + $0x10] sm:$0xff]  ;;  %v395_v15 = vld [vmem:[%s1796_s5 + $0x8] sm:$0xff] }
  0x92   : > { %1038 = vmatprep.subr.mxu0 %v407_v3  ;;  %1092 = vmatprep.subr.mxu1 %v407_v3  ;;  %v394_v16 = vld [vmem:[%s1796_s5] sm:$0xff]  ;;  %v379_v19 = vld [vmem:[%s1788_s11 + $0x8] sm:$0xff]  ;;  %v380_v21 = vld [vmem:[%s1788_s11 + $0x10] sm:$0xff] }
  0x93   : > { %1039 = vmatpush3.msra.mxu0 %v407_v3  ;;  %1108 = vmatpush3.msra.mxu1 %v407_v3  ;;  %v378_v17 = vld [vmem:[%s1788_s11] sm:$0xff]  ;;  %v387_v20 = vld [vmem:[%s1788_s11 + $0x48] sm:$0xff]  ;;  %v388_v22 = vld [vmem:[%s1788_s11 + $0x50] sm:$0xff] }
  0x94   : > { %1040 = vmatprep.subr.mxu0 %v406_v4  ;;  %1093 = vmatprep.subr.mxu1 %v406_v4  ;;  %v386_v18 = vld [vmem:[%s1788_s11 + $0x40] sm:$0xff]  ;;  %v381_v23 = vld [vmem:[%s1788_s11 + $0x18] sm:$0xff]  ;;  %v383_v27 = vld [vmem:[%s1788_s11 + $0x28] sm:$0xff] }
  0x95   : > { %1041 = vmatpush3.msra.mxu0 %v406_v4  ;;  %1109 = vmatpush3.msra.mxu1 %v406_v4  ;;  %v389_v24 = vld [vmem:[%s1788_s11 + $0x58] sm:$0xff]  ;;  %v382_v25 = vld [vmem:[%s1788_s11 + $0x20] sm:$0xff]  ;;  %v391_v28 = vld [vmem:[%s1788_s11 + $0x68] sm:$0xff] }
  0x96   : > { %1042 = vmatprep.subr.mxu0 %v405_v5  ;;  %1094 = vmatprep.subr.mxu1 %v405_v5  ;;  %v390_v26 = vld [vmem:[%s1788_s11 + $0x60] sm:$0xff]  ;;  %v384_v29 = vld [vmem:[%s1788_s11 + $0x30] sm:$0xff]  ;;  %v385_v31 = vld [vmem:[%s1788_s11 + $0x38] sm:$0xff] }
  0x97   : > { %1043 = vmatpush3.msra.mxu0 %v405_v5  ;;  %1110 = vmatpush3.msra.mxu1 %v405_v5  ;;  %v392_v30 = vld [vmem:[%s1788_s11 + $0x70] sm:$0xff]  ;;  %v393_v32 = vld [vmem:[%s1788_s11 + $0x78] sm:$0xff]  ;;  %v411_v33 = vld [vmem:[#allocation2] sm:$0xff]  ;;  %s2161_s11 = sld [smem:[#allocation14_spill]] }
  0x98   : > { %1044 = vmatprep.subr.mxu0 %v404_v6  ;;  %1095 = vmatprep.subr.mxu1 %v404_v6  ;;  %v419_v34 = vld [vmem:[#allocation2 + $0x20] sm:$0xff]  ;;  %v410_v37 = vld [vmem:[#allocation2 + $0x30] sm:$0xff]  ;;  %v413_v43 = vld [vmem:[#allocation2 + $0x18] sm:$0xff] }
  0x99   : > { %1045 = vmatpush3.msra.mxu0 %v404_v6  ;;  %1111 = vmatpush3.msra.mxu1 %v404_v6  ;;  %v418_v38 = vld [vmem:[#allocation2 + $0x40] sm:$0xff]  ;;  %v421_v44 = vld [vmem:[#allocation2 + $0x38] sm:$0xff]  ;;  %v420_v50 = vld [vmem:[#allocation2 + $0x10] sm:$0xff] }
  0x9a   : > { %1046 = vmatprep.subr.mxu0 %v403_v7  ;;  %1096 = vmatprep.subr.mxu1 %v403_v7  ;;  %v412_v49 = vld [vmem:[#allocation2 + $0x58] sm:$0xff]  ;;  %v415_v55 = vld [vmem:[#allocation2 + $0x68] sm:$0xff]  ;;  %v423_v56 = vld [vmem:[#allocation2 + $0x70] sm:$0xff] }
  0x9b   : > { %1047 = vmatpush3.msra.mxu0 %v403_v7  ;;  %1112 = vmatpush3.msra.mxu1 %v403_v7  ;;  %v414_v61 = vld [vmem:[#allocation2 + $0x50] sm:$0xff]  ;;  %v422_v62 = vld [vmem:[#allocation2 + $0x60] sm:$0xff]  ;;  %v417_v3 = vld [vmem:[#allocation2 + $0x48] sm:$0xff] }
  0x9c   : > { %1048 = vmatprep.subr.mxu0 %v402_v8  ;;  %1097 = vmatprep.subr.mxu1 %v402_v8  ;;  %v425_v4 = vld [vmem:[#allocation2 + $0x28] sm:$0xff] }
  0x9d   : > { %1049 = vmatpush3.msra.mxu0 %v402_v8  ;;  %1113 = vmatpush3.msra.mxu1 %v402_v8  ;;  %p994_p12 = scmp.ne.s32.totalorder %s2161_s11, 2 }
  0x9e   : > { %1050 = vmatprep.subr.mxu0 %v401_v9  ;;  %1098 = vmatprep.subr.mxu1 %v401_v9 }
  0x9f   : > { %1051 = vmatpush3.msra.mxu0 %v401_v9  ;;  %1114 = vmatpush3.msra.mxu1 %v401_v9  ;;  %v416_v9 = vld [vmem:[#allocation2 + $0x8] sm:$0xff] }
  0xa0   : > { %1052 = vmatprep.subr.mxu0 %v400_v10  ;;  %1099 = vmatprep.subr.mxu1 %v400_v10 }
  0xa1   : > { %1053 = vmatpush3.msra.mxu0 %v400_v10  ;;  %1115 = vmatpush3.msra.mxu1 %v400_v10  ;;  %v424_v10 = vld [vmem:[#allocation2 + $0x78] sm:$0xff] }
  0xa2   : > { %1054 = vmatprep.subr.mxu0 %v399_v11  ;;  %1100 = vmatprep.subr.mxu1 %v399_v11 }
  0xa3   : > { %1055 = vmatpush3.msra.mxu0 %v399_v11  ;;  %1116 = vmatpush3.msra.mxu1 %v399_v11 }
  0xa4   : > { %1056 = vmatprep.subr.mxu0 %v398_v12  ;;  %1101 = vmatprep.subr.mxu1 %v398_v12 }
  0xa5   : > { %1057 = vmatpush3.msra.mxu0 %v398_v12  ;;  %1117 = vmatpush3.msra.mxu1 %v398_v12 }
  0xa6   : > { %1058 = vmatprep.subr.mxu0 %v397_v13  ;;  %1102 = vmatprep.subr.mxu1 %v397_v13 }
  0xa7   : > { %1059 = vmatpush3.msra.mxu0 %v397_v13  ;;  %1118 = vmatpush3.msra.mxu1 %v397_v13 }
  0xa8   : > { %1060 = vmatprep.subr.mxu0 %v396_v14  ;;  %1103 = vmatprep.subr.mxu1 %v396_v14 }
  0xa9   : > { %1061 = vmatpush3.msra.mxu0 %v396_v14  ;;  %1119 = vmatpush3.msra.mxu1 %v396_v14 }
  0xaa   : > { %1062 = vmatprep.subr.mxu0 %v395_v15  ;;  %1104 = vmatprep.subr.mxu1 %v395_v15 }
  0xab   : > { %1063 = vmatpush3.msra.mxu0 %v395_v15  ;;  %1120 = vmatpush3.msra.mxu1 %v395_v15 }
  0xac   : > { %1064 = vmatprep.subr.mxu0 %v394_v16  ;;  %1105 = vmatprep.subr.mxu1 %v394_v16 }
  0xad   : > { %1065 = vmatpush3.msra.mxu0 %v394_v16  ;;  %1121 = vmatpush3.msra.mxu1 %v394_v16 }
  0xae   : > { %1066 = vmatprep.mubr.f32.mxu0 %v378_v17  ;;  %1078 = vmatprep.mubr.f32.mxu1 %v386_v18 }
  0xaf   : > { %1067 = vmatmul.mubr.f32.vlgmr.msra.gmra.mxu0 %v379_v19  ;;  %1079 = vmatmul.mubr.f32.vlgmr.msra.gmra.mxu1 %v387_v20 }
  0xb0   : > { %1069 = vmatprep.mubr.f32.mxu0 %v380_v21  ;;  %1081 = vmatprep.mubr.f32.mxu1 %v388_v22 }
  0xb3   : > { %1070 = vmatmul.mubr.f32.gmra.mxu0 %v381_v23  ;;  %1082 = vmatmul.mubr.f32.gmra.mxu1 %v389_v24 }
  0xb4   : > { %1072 = vmatprep.mubr.f32.mxu0 %v382_v25  ;;  %1084 = vmatprep.mubr.f32.mxu1 %v390_v26 }
  0xb7   : > { %1073 = vmatmul.mubr.f32.gmra.mxu0 %v383_v27  ;;  %1085 = vmatmul.mubr.f32.gmra.mxu1 %v391_v28 }
  0xb8   : > { %1075 = vmatprep.mubr.f32.mxu0 %v384_v29  ;;  %1087 = vmatprep.mubr.f32.mxu1 %v392_v30 }
  0xbb   : > { %1076 = vmatmul.mubr.f32.gmra.mxu0 %v385_v31  ;;  %1088 = vmatmul.mubr.f32.gmra.mxu1 %v393_v32 }
 0x16f   : > { %v1068_v35 = vpop.f32.mrf.mxu0  ;;  %v1080_v36 = vpop.f32.mrf.mxu1 }
 0x170   : > { %v572_v39 = vadd.f32 %v1068_v35, %v411_v33  ;;  %v580_v40 = vadd.f32 %v1080_v36, %v419_v34 }
 0x171   : > { %v492_v41 = vpop.f32.mrf.mxu0  ;;  %v532_v42 = vpop.f32.mrf.mxu1 }
 0x172   : > { %588 = vst [vmem:[#allocation2] sm:$0xff] %v572_v39  ;;  %596 = vst [vmem:[#allocation2 + $0x20] sm:$0xff] %v580_v40  ;;  %v571_v45 = vadd.f32 %v492_v41, %v410_v37  ;;  %v579_v46 = vadd.f32 %v532_v42, %v418_v38 }
 0x173   : > { %v1071_v47 = vpop.f32.mrf.mxu0  ;;  %v1083_v48 = vpop.f32.mrf.mxu1 }
 0x174   : > { %587 = vst [vmem:[#allocation2 + $0x30] sm:$0xff] %v571_v45  ;;  %595 = vst [vmem:[#allocation2 + $0x40] sm:$0xff] %v579_v46  ;;  %v574_v51 = vadd.f32 %v1071_v47, %v413_v43  ;;  %v582_v52 = vadd.f32 %v1083_v48, %v421_v44 }
 0x175   : > { %v502_v53 = vpop.f32.mrf.mxu0  ;;  %v542_v54 = vpop.f32.mrf.mxu1 }
 0x176   : > { %590 = vst [vmem:[#allocation2 + $0x18] sm:$0xff] %v574_v51  ;;  %598 = vst [vmem:[#allocation2 + $0x38] sm:$0xff] %v582_v52  ;;  %v573_v57 = vadd.f32 %v502_v53, %v412_v49  ;;  %v581_v58 = vadd.f32 %v542_v54, %v420_v50 }
 0x177   : > { %v1074_v59 = vpop.f32.mrf.mxu0  ;;  %v1086_v60 = vpop.f32.mrf.mxu1 }
 0x178   : > { %589 = vst [vmem:[#allocation2 + $0x58] sm:$0xff] %v573_v57  ;;  %597 = vst [vmem:[#allocation2 + $0x10] sm:$0xff] %v581_v58  ;;  %v576_v63 = vadd.f32 %v1074_v59, %v415_v55  ;;  %v584_v0 = vadd.f32 %v1086_v60, %v423_v56 }
 0x179   : > { %v512_v1 = vpop.f32.mrf.mxu0  ;;  %v552_v2 = vpop.f32.mrf.mxu1 }
 0x17a   : > { %592 = vst [vmem:[#allocation2 + $0x68] sm:$0xff] %v576_v63  ;;  %600 = vst [vmem:[#allocation2 + $0x70] sm:$0xff] %v584_v0  ;;  %v575_v5 = vadd.f32 %v512_v1, %v414_v61  ;;  %v583_v6 = vadd.f32 %v552_v2, %v422_v62 }
 0x17b   : > { %v1077_v7 = vpop.f32.mrf.mxu0  ;;  %v1089_v8 = vpop.f32.mrf.mxu1 }
 0x17c   : > { %591 = vst [vmem:[#allocation2 + $0x50] sm:$0xff] %v575_v5  ;;  %599 = vst [vmem:[#allocation2 + $0x60] sm:$0xff] %v583_v6  ;;  %v578_v11 = vadd.f32 %v1077_v7, %v417_v3  ;;  %v586_v12 = vadd.f32 %v1089_v8, %v425_v4  ;;  %606 = sbr.rel (%p994_p12) target bundleno = 474 (0x1da), region = 60 }
 0x17d   : > { %v522_v13 = vpop.f32.mrf.mxu0  ;;  %v562_v14 = vpop.f32.mrf.mxu1 }
 0x17e   : > { %594 = vst [vmem:[#allocation2 + $0x48] sm:$0xff] %v578_v11  ;;  %602 = vst [vmem:[#allocation2 + $0x28] sm:$0xff] %v586_v12  ;;  %v577_v15 = vadd.f32 %v522_v13, %v416_v9  ;;  %v585_v16 = vadd.f32 %v562_v14, %v424_v10 }
 0x180   : > { %593 = vst [vmem:[#allocation2 + $0x8] sm:$0xff] %v577_v15  ;;  %601 = vst [vmem:[#allocation2 + $0x78] sm:$0xff] %v585_v16 }
 0x181   : > { %v607_v17 = vld [vmem:[#allocation2 + $0x30] sm:$0xff]  ;;  %v608_v18 = vld [vmem:[#allocation2] sm:$0xff]  ;;  %v609_v19 = vld [vmem:[#allocation2 + $0x58] sm:$0xff] }
 0x182   : > { %v1864_v20 = vld [vmem:[%s354_s14] ss:$0 sm:$0xff]  ;;  %v610_v23 = vld [vmem:[#allocation2 + $0x18] sm:$0xff]  ;;  %v612_v26 = vld [vmem:[#allocation2 + $0x68] sm:$0xff] }
 0x183   : > { %v630_v21 = vadd.f32 %v1864_v20, %v607_v17  ;;  %v631_v22 = vadd.f32 %v1864_v20, %v608_v18  ;;  %v632_v24 = vadd.f32 %v1864_v20, %v609_v19  ;;  %v611_v25 = vld [vmem:[#allocation2 + $0x50] sm:$0xff]  ;;  %v633_v27 = vadd.f32 %v1864_v20, %v610_v23  ;;  %v615_v39 = vld [vmem:[#allocation2 + $0x40] sm:$0xff]  ;;  %v618_v57 = vld [vmem:[#allocation2 + $0x38] sm:$0xff] }
 0x184   : > { %v634_v30 = vadd.f32 %v1864_v20, %v611_v25  ;;  %v635_v33 = vadd.f32 %v1864_v20, %v612_v26  ;;  %v616_v45 = vld [vmem:[#allocation2 + $0x20] sm:$0xff]  ;;  %v638_v50 = vadd.f32 %v1864_v20, %v615_v39  ;;  %v617_v51 = vld [vmem:[#allocation2 + $0x10] sm:$0xff]  ;;  %v641_v4 = vadd.f32 %v1864_v20, %v618_v57 }
 0x185   : > { %v1870_v28 = vmax.f32 %v630_v21, 0.0  ;;  %v1872_v29 = vmax.f32 %v631_v22, 0.0  ;;  %v1875_v31 = vmax.f32 %v632_v24, 0.0  ;;  %v614_v34 = vld [vmem:[#allocation2 + $0x48] sm:$0xff]  ;;  %v1878_v35 = vmax.f32 %v633_v27, 0.0  ;;  %v619_v63 = vld [vmem:[#allocation2 + $0x60] sm:$0xff] }
 0x186   : > { %v1887_v41 = vmax.f32 %v634_v30, 0.0  ;;  %v637_v44 = vadd.f32 %v1864_v20, %v614_v34  ;;  %v1893_v46 = vmax.f32 %v635_v33, 0.0  ;;  %v639_v56 = vadd.f32 %v1864_v20, %v616_v45  ;;  %v620_v5 = vld [vmem:[#allocation2 + $0x70] sm:$0xff]  ;;  %v622_v17 = vld [vmem:[#allocation2 + $0x28] sm:$0xff] }
 0x187   : > { %v613_v32 = vld [vmem:[#allocation2 + $0x8] sm:$0xff]  ;;  %v662_v36 = vadd.f32 %v1872_v29, %v1870_v28  ;;  %v683_v37 = vmul.f32 %v1870_v28, %v1870_v28  ;;  %v684_v38 = vmul.f32 %v1872_v29, %v1872_v29  ;;  %v685_v43 = vmul.f32 %v1875_v31, %v1875_v31  ;;  %v621_v11 = vld [vmem:[#allocation2 + $0x78] sm:$0xff] }
 0x188   : > { %v636_v40 = vadd.f32 %v1864_v20, %v613_v32  ;;  %v686_v48 = vmul.f32 %v1878_v35, %v1878_v35  ;;  %v687_v54 = vmul.f32 %v1887_v41, %v1887_v41  ;;  %v1905_v58 = vmax.f32 %v637_v44, 0.0 }
 0x189   : > { %v663_v42 = vadd.f32 %v662_v36, %v1875_v31  ;;  %v699_v49 = vadd.f32 %v684_v38, %v683_v37  ;;  %v688_v60 = vmul.f32 %v1893_v46, %v1893_v46  ;;  %v640_v62 = vadd.f32 %v1864_v20, %v617_v51 }
 0x18a   : > { %v1899_v52 = vmax.f32 %v636_v40, 0.0  ;;  %v1911_v0 = vmax.f32 %v638_v50, 0.0  ;;  %v1917_v6 = vmax.f32 %v639_v56, 0.0  ;;  %v690_v8 = vmul.f32 %v1905_v58, %v1905_v58 }
 0x18b   : > { %v664_v47 = vadd.f32 %v663_v42, %v1878_v35  ;;  %v700_v55 = vadd.f32 %v699_v49, %v685_v43  ;;  %v642_v10 = vadd.f32 %v1864_v20, %v619_v63  ;;  %v1923_v12 = vmax.f32 %v640_v62, 0.0 }
 0x18c   : > { %v689_v2 = vmul.f32 %v1899_v52, %v1899_v52  ;;  %v691_v14 = vmul.f32 %v1911_v0, %v1911_v0  ;;  %v643_v16 = vadd.f32 %v1864_v20, %v620_v5  ;;  %v1929_v18 = vmax.f32 %v641_v4, 0.0 }
 0x18d   : > { %v665_v53 = vadd.f32 %v664_v47, %v1887_v41  ;;  %v701_v61 = vadd.f32 %v700_v55, %v686_v48  ;;  %v692_v21 = vmul.f32 %v1917_v6, %v1917_v6  ;;  %v644_v23 = vadd.f32 %v1864_v20, %v621_v11 }
 0x18e   : > { %v1935_v24 = vmax.f32 %v642_v10, 0.0  ;;  %v693_v26 = vmul.f32 %v1923_v12, %v1923_v12  ;;  %v645_v30 = vadd.f32 %v1864_v20, %v622_v17  ;;  %v1941_v32 = vmax.f32 %v643_v16, 0.0 }
 0x18f   : > { %v666_v59 = vadd.f32 %v665_v53, %v1893_v46  ;;  %v702_v3 = vadd.f32 %v701_v61, %v687_v54  ;;  %v694_v34 = vmul.f32 %v1929_v18, %v1929_v18  ;;  %v1946_v37 = vmax.f32 %v644_v23, 0.0 }
 0x190   : > { %v695_v39 = vmul.f32 %v1935_v24, %v1935_v24  ;;  %v1951_v42 = vmax.f32 %v645_v30, 0.0  ;;  %v696_v43 = vmul.f32 %v1941_v32, %v1941_v32 }
 0x191   : > { %v667_v1 = vadd.f32 %v666_v59, %v1899_v52  ;;  %v703_v9 = vadd.f32 %v702_v3, %v688_v60  ;;  %v697_v47 = vmul.f32 %v1946_v37, %v1946_v37 }
 0x192   : > { %v698_v50 = vmul.f32 %v1951_v42, %v1951_v42 }
 0x193   : > { %v668_v7 = vadd.f32 %v667_v1, %v1905_v58  ;;  %v704_v15 = vadd.f32 %v703_v9, %v689_v2 }
 0x195   : > { %v669_v13 = vadd.f32 %v668_v7, %v1911_v0  ;;  %v705_v22 = vadd.f32 %v704_v15, %v690_v8 }
 0x197   : > { %v670_v19 = vadd.f32 %v669_v13, %v1917_v6  ;;  %v706_v27 = vadd.f32 %v705_v22, %v691_v14  ;;  %v996_v22 = vld [vmem:[%s309_s13] ss:$0 sm:$0xff] }
 0x199   : > { %v671_v25 = vadd.f32 %v670_v19, %v1923_v12  ;;  %v707_v36 = vadd.f32 %v706_v27, %v692_v21 }
 0x19b   : > { %v672_v33 = vadd.f32 %v671_v25, %v1929_v18  ;;  %v708_v40 = vadd.f32 %v707_v36, %v693_v26 }
 0x19d   : > { %v673_v38 = vadd.f32 %v672_v33, %v1935_v24  ;;  %v709_v44 = vadd.f32 %v708_v40, %v694_v34 }
 0x19f   : > { %v674_v20 = vadd.f32 %v673_v38, %v1941_v32  ;;  %v710_v48 = vadd.f32 %v709_v44, %v695_v39 }
 0x1a1   : > { %v675_v45 = vadd.f32 %v674_v20, %v1946_v37  ;;  %v711_v51 = vadd.f32 %v710_v48, %v696_v43 }
 0x1a3   : > { %v676_v49 = vadd.f32 %v675_v45, %v1951_v42  ;;  %v712_v54 = vadd.f32 %v711_v51, %v697_v47 }
 0x1a5   : > { %v677_v53 = vrot.slane %v676_v49, 4  ;;  %v713_v56 = vadd.f32 %v712_v54, %v698_v50 }
 0x1a7   : > { %v678_v55 = vadd.f32 %v677_v53, %v676_v49  ;;  %v714_v59 = vrot.slane %v713_v56, 4 }
 0x1a9   : > { %v679_v57 = vrot.slane %v678_v55, 2  ;;  %v715_v61 = vadd.f32 %v714_v59, %v713_v56 }
 0x1ab   : > { %v680_v60 = vadd.f32 %v679_v57, %v678_v55  ;;  %v716_v63 = vrot.slane %v715_v61, 2 }
 0x1ad   : > { %v681_v62 = vrot.slane %v680_v60, 1  ;;  %v717_v2 = vadd.f32 %v716_v63, %v715_v61 }
 0x1af   : > { %v682_v1 = vadd.f32 %v681_v62, %v680_v60  ;;  %v718_v3 = vrot.slane %v717_v2, 1 }
 0x1b1   : > { %v1962_v4 = vmul.f32 0.0078125, %v682_v1  ;;  %v719_v5 = vadd.f32 %v718_v3, %v717_v2 }
 0x1b3   : > { %v722_v7 = vmul.f32 %v1962_v4, %v1962_v4  ;;  %v721_v8 = vmul.f32 0.0078125, %v719_v5  ;;  %v725_v13 = vsub.f32 %v1870_v28, %v1962_v4  ;;  %v726_v14 = vsub.f32 %v1872_v29, %v1962_v4 }
 0x1b4   : > { %v727_v15 = vsub.f32 %v1875_v31, %v1962_v4  ;;  %v728_v16 = vsub.f32 %v1878_v35, %v1962_v4  ;;  %v729_v17 = vsub.f32 %v1887_v41, %v1962_v4  ;;  %v730_v19 = vsub.f32 %v1893_v46, %v1962_v4 }
 0x1b5   : > { %v723_v9 = vsub.f32 %v721_v8, %v722_v7  ;;  %v731_v21 = vsub.f32 %v1899_v52, %v1962_v4  ;;  %v732_v28 = vsub.f32 %v1905_v58, %v1962_v4  ;;  %v733_v29 = vsub.f32 %v1911_v0, %v1962_v4 }
 0x1b6   : > { %v734_v31 = vsub.f32 %v1917_v6, %v1962_v4  ;;  %v735_v35 = vsub.f32 %v1923_v12, %v1962_v4  ;;  %v736_v41 = vsub.f32 %v1929_v18, %v1962_v4  ;;  %v737_v52 = vsub.f32 %v1935_v24, %v1962_v4  ;;  %v997_v18 = vld [vmem:[%s357_s17] ss:$0 sm:$0xff] }
 0x1b7   : > { %v724_v10 = vmax.f32 %v723_v9, 0.0  ;;  %v738_v58 = vsub.f32 %v1941_v32, %v1962_v4  ;;  %v739_v0 = vsub.f32 %v1946_v37, %v1962_v4  ;;  %v740_v6 = vsub.f32 %v1951_v42, %v1962_v4 }
 0x1b9   : > { %v741_v11 = vadd.f32 1e-05, %v724_v10 }
 0x1bb   : > { %1266 = vrsqrt.f32 %v741_v11 }
 0x1c8   : > { %v1267_v46 = vpop.eup %1266 }
 0x1c9   : > { %v743_v23 = vmul.f32 %v1267_v46, %v725_v13  ;;  %v744_v12 = vmul.f32 %v1267_v46, %v726_v14  ;;  %v745_v25 = vmul.f32 %v1267_v46, %v727_v15  ;;  %v746_v26 = vmul.f32 %v1267_v46, %v728_v16 }
 0x1ca   : > { %v747_v27 = vmul.f32 %v1267_v46, %v729_v17  ;;  %v748_v24 = vmul.f32 %v1267_v46, %v730_v19  ;;  %v749_v30 = vmul.f32 %v1267_v46, %v731_v21  ;;  %v750_v33 = vmul.f32 %v1267_v46, %v732_v28 }
 0x1cb   : > { %v766_v32 = vmul.f32 %v996_v22, %v743_v23  ;;  %v767_v34 = vmul.f32 %v996_v22, %v744_v12  ;;  %v768_v36 = vmul.f32 %v996_v22, %v745_v25  ;;  %v769_v37 = vmul.f32 %v996_v22, %v746_v26 }
 0x1cc   : > { %v770_v38 = vmul.f32 %v996_v22, %v747_v27  ;;  %v771_v39 = vmul.f32 %v996_v22, %v748_v24  ;;  %v772_v40 = vmul.f32 %v996_v22, %v749_v30  ;;  %v773_v42 = vmul.f32 %v996_v22, %v750_v33 }
 0x1cd   : > { %v789_v20 = vadd.f32 %v997_v18, %v766_v32  ;;  %v790_v43 = vadd.f32 %v997_v18, %v767_v34  ;;  %v791_v44 = vadd.f32 %v997_v18, %v768_v36  ;;  %v792_v45 = vadd.f32 %v997_v18, %v769_v37 }
 0x1ce   : > { %v793_v47 = vadd.f32 %v997_v18, %v770_v38  ;;  %v794_v48 = vadd.f32 %v997_v18, %v771_v39  ;;  %v795_v49 = vadd.f32 %v997_v18, %v772_v40  ;;  %v796_v50 = vadd.f32 %v997_v18, %v773_v42 }
 0x1cf   : > { %805 = vst [vmem:[%s1823_s30] sm:$0xff] %v789_v20  ;;  %806 = vst [vmem:[%s1823_s30 + $0x8] sm:$0xff] %v790_v43  ;;  %v751_v51 = vmul.f32 %v1267_v46, %v733_v29  ;;  %v752_v53 = vmul.f32 %v1267_v46, %v734_v31  ;;  %v753_v54 = vmul.f32 %v1267_v46, %v735_v35 }
 0x1d0   : > { %807 = vst [vmem:[%s1823_s30 + $0x10] sm:$0xff] %v791_v44  ;;  %808 = vst [vmem:[%s1823_s30 + $0x18] sm:$0xff] %v792_v45  ;;  %v754_v55 = vmul.f32 %v1267_v46, %v736_v41  ;;  %v755_v56 = vmul.f32 %v1267_v46, %v737_v52  ;;  %v756_v57 = vmul.f32 %v1267_v46, %v738_v58 }
 0x1d1   : > { %809 = vst [vmem:[%s1823_s30 + $0x20] sm:$0xff] %v793_v47  ;;  %810 = vst [vmem:[%s1823_s30 + $0x28] sm:$0xff] %v794_v48  ;;  %v757_v59 = vmul.f32 %v1267_v46, %v739_v0  ;;  %v758_v60 = vmul.f32 %v1267_v46, %v740_v6  ;;  %v774_v61 = vmul.f32 %v996_v22, %v751_v51 }
 0x1d2   : > { %811 = vst [vmem:[%s1823_s30 + $0x30] sm:$0xff] %v795_v49  ;;  %812 = vst [vmem:[%s1823_s30 + $0x38] sm:$0xff] %v796_v50  ;;  %v775_v62 = vmul.f32 %v996_v22, %v752_v53  ;;  %v776_v63 = vmul.f32 %v996_v22, %v753_v54  ;;  %v777_v1 = vmul.f32 %v996_v22, %v754_v55 }
 0x1d3   : > { %v778_v2 = vmul.f32 %v996_v22, %v755_v56  ;;  %v779_v3 = vmul.f32 %v996_v22, %v756_v57  ;;  %v780_v4 = vmul.f32 %v996_v22, %v757_v59  ;;  %v781_v5 = vmul.f32 %v996_v22, %v758_v60 }
 0x1d4   : > { %v797_v7 = vadd.f32 %v997_v18, %v774_v61  ;;  %v798_v8 = vadd.f32 %v997_v18, %v775_v62  ;;  %v799_v9 = vadd.f32 %v997_v18, %v776_v63  ;;  %v800_v10 = vadd.f32 %v997_v18, %v777_v1 }
 0x1d5   : > { %v801_v11 = vadd.f32 %v997_v18, %v778_v2  ;;  %v802_v13 = vadd.f32 %v997_v18, %v779_v3  ;;  %v803_v14 = vadd.f32 %v997_v18, %v780_v4  ;;  %v804_v15 = vadd.f32 %v997_v18, %v781_v5 }
 0x1d6   : > { %813 = vst [vmem:[%s1823_s30 + $0x40] sm:$0xff] %v797_v7  ;;  %814 = vst [vmem:[%s1823_s30 + $0x48] sm:$0xff] %v798_v8 }
 0x1d7   : > { %815 = vst [vmem:[%s1823_s30 + $0x50] sm:$0xff] %v799_v9  ;;  %816 = vst [vmem:[%s1823_s30 + $0x58] sm:$0xff] %v800_v10 }
 0x1d8   : > { %817 = vst [vmem:[%s1823_s30 + $0x60] sm:$0xff] %v801_v11  ;;  %818 = vst [vmem:[%s1823_s30 + $0x68] sm:$0xff] %v802_v13 }
 0x1d9   : > { %819 = vst [vmem:[%s1823_s30 + $0x70] sm:$0xff] %v803_v14  ;;  %820 = vst [vmem:[%s1823_s30 + $0x78] sm:$0xff] %v804_v15 }
 0x1da PF: > { %s2164_s13 = sld [smem:[#allocation15_spill]]  ;;  %s834_s29 = sshll.u32 %s1823_s30, 4  ;;  %s2028_s29 = int_to_ptr.vmem [resolvable:$true] %s834_s29 }
 0x1db   : > { %s2165_s14 = sld [smem:[#allocation26_spill]]  ;;  %s822_s21 = scalar_lea.sflag [#allocation5], %s1803_s9 }
 0x1dc   : > { %s1352_s17 = scalar_lea.vmem %s2028_s29, 2048  ;;  %p2166_p13 = scmp.ne.s32.totalorder %s2150_s15, 0 }
 0x1dd   : > { %p1353_p4 = scmp.ne.s32.totalorder %s2028_s29, %s1352_s17  ;;  %s1513_s24 = smov [#allocation9]  }
 0x1de   : > { %s1356_s11 = sshll.u32 %s1513_s24, 4  ;;  %s1357_s11 = int_to_ptr.vmem [resolvable:$false] %s1356_s11 }
 0x1df   : > { %p1354_p6 = pnand %p1353_p4, %p2166_p13  ;;  %s1358_s2 = scalar_lea.vmem %s1357_s11, 4096 }
 0x1e0   : > { %s999_s1 = sshll.u32 %s2164_s13, 7  ;;  %p1359_p3 = scmp.lt.s32.totalorder %s2028_s29, %s1357_s11 }
 0x1e1   : > { %s2025_s12 = scalar_lea.hbm %s2165_s14, %s999_s1  ;;  %p1355_p2 = pneg %p1354_p6 }
 0x1e2   : > { %p1360_p8 = scmp.lt.s32.totalorder %s1358_s2, %s1352_s17 }
 0x1e4   : > { %p1361_p0 = por %p1360_p8, %p1359_p3 }
 0x1e6   : > { %p1362_p9 = pnand %p1361_p0, %p1355_p2 }
 0x1e8   : > { %1365 = shalt.err (!%p1362_p9)
}
 0x1e9   : > { %s1366_s30 = scalar_lea.hbm %s2025_s12, 2048  ;;  %s1370_s5 = scalar_lea.hbm %s2165_s14, 6144 }
 0x1ea   : > { %p1367_p11 = scmp.ne.s32.totalorder %s2025_s12, %s1366_s30  ;;  %p1371_p5 = scmp.lt.s32.totalorder %s2025_s12, %s2165_s14 }
 0x1eb   : > { %p1372_p7 = scmp.lt.s32.totalorder %s1370_s5, %s1366_s30 }
 0x1ec   : > { %p1368_p1 = pnand %p1367_p11, %p2166_p13 }
 0x1ed   : > { %p1373_p12 = por %p1372_p7, %p1371_p5 }
 0x1ee   : > { %p1369_p10 = pneg %p1368_p1 }
 0x1f0   : > { %p1374_p4 = pnand %p1373_p12, %p1369_p10 }
 0x1f2   : > { %1377 = shalt.err (!%p1374_p4)
}
 0x1f3   : > { %s1514_s13 = smov 128   ;;  %s1515_s1 = smov 384  }
 0x1f4   : > { %s1516_s4 = smov 8  }
 0x1f5   : > { %1129 = dma.vmem_to_hbm [thread:$0]  (%p2166_p13), %s2028_s29, 2048, %s2025_s12, %s822_s21, %s1514_s13, %s1515_s1, %s1516_s4  }
 0x1f6 PF: > { %p1146_p6 = scmp.ge.s32.totalorder %s1504_s6, 2  ;;  %s849_s3 = sand.u32 1, %s1452_s18  }
 0x1f7   : > { %p2167_p2 = scmp.ne.s32.totalorder %s2152_s0, 0  ;;  %s850_s17 = scalar_lea.sflag [#allocation5], %s849_s3 }
 0x1f9   : > { %p1142_p3 = pnand %p1146_p6, %p2167_p2 }
 0x1fb   : > { %p1143_p8 = pneg %p1142_p3 }
 0x1fd   : > { %1447 = dma.done.wait (%p1143_p8), %s850_s17, 2048  }
 0x1fe   : > { %1449 = vsyncadd (%p1143_p8), %s850_s17, 4294965248  ;;  %s24_s6 = sadd.s32 1, %s1504_s6   ;;  %s2169_s0 = sld [smem:[#allocation19_spill]] }
 0x1ff   : > { %p2058_p0 = scmp.ge.s32.totalorder %s24_s6, 11   ;;  %s2170_s27 = sld [smem:[#allocation16_spill]] }
 0x200   : > { %s2171_s15 = sld [smem:[#allocation17_spill]]  ;;  %s2175_s18 = smov %s1456_s19 }
 0x201   : > { %s2172_s29 = sld [smem:[#allocation18_spill]]  ;;  %s2176_s19 = smov %s1460_s20 }
 0x202   : > { %s2173_s30 = sld [smem:[#allocation20_spill]]  ;;  %s2177_s20 = smov %s1753_s28 }
 0x203   : > { %s2178_s21 = smov %s1468_s22  ;;  %s2179_s22 = smov %s1472_s23 }
 0x204   : > { %s2180_s23 = smov %s1758_s16  ;;  %s2181_s24 = smov %s1480_s25 }
 0x205   : > { %s2182_s25 = smov %s1484_s26  ;;  %s2183_s26 = smov %s2169_s0 }
 0x206   : > { %s2184_s28 = smov %s2171_s15  ;;  %23 = sbr.rel (!%p2058_p0) target bundleno = 19 (0x13), region = 123 }
 0x20b   :  { %855 = vsyncpa [#allocation4], 1 }
 0x20c   :  { %857 = vsyncpa [#allocation4 + $0x1], 1 }
 0x20d   :  { %858 = vsyncpa [#allocation7], 1 }
 0x20e   :  { %860 = vsyncpa [#allocation7 + $0x1], 1 }
 0x20f   :  { %861 = vsyncpa [#allocation5], 1 }
 0x210   :  { %863 = vsyncpa [#allocation5 + $0x1], 1 }

</bundles_post_ra>
